<compile_context>
chip_gen: v5e
topology: v5e:2x2
jax: 0.10.0
libtpu: 0.0.40
codegen_flags: <defaults>
</compile_context>

<pallas_src>
import jax
import jax.numpy as jnp
from jax import lax
from jax.experimental import pallas as pl
from jax.experimental.pallas import tpu as pltpu

EPS = 1e-5
NEG_SLOPE = 0.2


def resblock_kernel(x_ref, b1_ref, b2_ref, g1_ref, be1_ref, g2_ref, be2_ref,
                    pool_ref, out_ref, pad_ref, row_ref):
    # x_ref    : (N, H, L)     lane-dense input, L = W*C
    # b*_ref   : (3L, L)       stacked banded conv weights (3 H-taps along K)
    # g*/be*   : (1, L)        BN gamma / beta tiled to the (w, c) lane pattern
    # pool_ref : (L, L)        per-channel averaging matrix (sum over w, /N*H*W)
    # out_ref  : (N, H, L)
    # pad_ref  : (N, H+2, L)   VMEM scratch: H-halo-padded conv source
    # row_ref  : (N*H, 3L)     VMEM scratch: im2row LHS (three taps side by side)
    N, H, L = x_ref.shape
    M = N * H

    def conv3x3(b_ref):
        # Build the (M, 3L) im2row LHS with three lane-aligned copies out of
        # the halo-padded scratch, then ONE (M, 3L) x (3L, L) MXU matmul.
        # The banded RHS encodes the W shifts + W zero padding; pad_ref
        # handles the H zero padding.
        row_ref[:, 0 * L:1 * L] = pad_ref[:, 0:H, :].reshape(M, L)
        row_ref[:, 1 * L:2 * L] = pad_ref[:, 1:H + 1, :].reshape(M, L)
        row_ref[:, 2 * L:3 * L] = pad_ref[:, 2:H + 2, :].reshape(M, L)
        return jnp.dot(row_ref[...], b_ref[...],
                       preferred_element_type=jnp.float32)

    def batchnorm(y, g_ref, be_ref):
        # One-pass batch stats (sum, sum of squares) folded into a single
        # per-channel scale/shift; pool_ref both reduces over the w lane
        # groups and re-broadcasts to the 128-lane pattern.
        s = jnp.sum(y, axis=0, keepdims=True)            # (1, L)
        ss = jnp.sum(y * y, axis=0, keepdims=True)       # (1, L)
        stats = jnp.dot(jnp.concatenate([s, ss], axis=0), pool_ref[...],
                        preferred_element_type=jnp.float32)   # (2, L)
        mean = stats[0:1, :]
        var = stats[1:2, :] - mean * mean                # biased variance
        scale = g_ref[...] * lax.rsqrt(var + EPS)
        shift = be_ref[...] - mean * scale
        return y * scale + shift                         # 2 VPU ops / element

    # ---- in-kernel H-halo padding of the input (zero only the halo rows) ----
    zero_row = jnp.zeros((N, 1, L), jnp.float32)
    pad_ref[:, 0:1, :] = zero_row
    pad_ref[:, H + 1:H + 2, :] = zero_row
    pad_ref[:, 1:H + 1, :] = x_ref[...]

    # ---- conv1 (bias dropped: exactly cancelled by BN) + BN1 + LeakyReLU ----
    y = conv3x3(b1_ref)
    y = batchnorm(y, g1_ref, be1_ref)
    y = jnp.maximum(y, NEG_SLOPE * y)

    # reuse the pad scratch for the conv2 intermediate (halo rows still zero)
    pad_ref[:, 1:H + 1, :] = y.reshape(N, H, L)

    # ---- conv2 (bias dropped) + BN2 ----
    y2 = conv3x3(b2_ref)
    y2 = batchnorm(y2, g2_ref, be2_ref)

    # ---- residual add (skip read straight from the unpadded input ref) ----
    out_ref[...] = x_ref[...] + y2.reshape(N, H, L)


def _banded_weights(w_hwio, W):
    # (3, 3, C, C) HWIO conv weights -> (3*W*C, W*C) stacked banded matrices.
    # Row dh*L + w_in*C + ci, col w_out*C + co = w[dh, w_in - w_out + 1, ci, co]
    # for |w_in - w_out| <= 1, else 0  (encodes the W shift + W zero padding).
    C = w_hwio.shape[2]
    L = W * C
    delta = jnp.arange(W)[:, None] - jnp.arange(W)[None, :] + 1        # (W, W)
    valid = ((delta >= 0) & (delta <= 2)).astype(w_hwio.dtype)
    dw = jnp.clip(delta, 0, 2)
    blocks = w_hwio[:, dw] * valid[None, :, :, None, None]      # (3, W, W, C, C)
    return blocks.transpose(0, 1, 3, 2, 4).reshape(3 * L, L)


def _channel_pool(C, W, count):
    # (L, L) matrix: pool[l, l'] = 1/count if channel(l) == channel(l') else 0
    ch = jnp.tile(jnp.arange(C), W)
    return (ch[:, None] == ch[None, :]).astype(jnp.float32) / float(count)


def fold_params(p, N, C, H, W):
    # Fold PyTorch-style params into the kernel's lane-dense constants once
    # (per network, not per call).  Conv biases p['b1']/p['b2'] are
    # intentionally NOT used: a per-channel constant added before
    # training-mode BN is a mathematical no-op.
    L = W * C
    tile = lambda v: jnp.tile(v.reshape(C), W).reshape(1, L)
    return {
        'b1': _banded_weights(p['w1'], W),
        'b2': _banded_weights(p['w2'], W),
        'g1': tile(p['g1']), 'be1': tile(p['be1']),
        'g2': tile(p['g2']), 'be2': tile(p['be2']),
        'pool': _channel_pool(C, W, N * H * W),
    }


def residual_block_lanedense(x_ls, fp):
    # Lane-dense core: x_ls is (N, H, W*C), returns the same layout.  In a
    # real network, keep activations in this layout across consecutive
    # residual blocks so the NCHW relayout is paid once per network.
    N, H, L = x_ls.shape
    M = N * H
    vmem = pl.BlockSpec(memory_space=pltpu.MemorySpace.VMEM)

    operands = (x_ls, fp['b1'], fp['b2'], fp['g1'], fp['be1'], fp['g2'],
                fp['be2'], fp['pool'])

    # VMEM plan derived from the actual buffer sum (not a blanket 32 MiB),
    # clamped to v7x's 64 MiB physical VMEM so the plan stays portable.
    buf_bytes = sum(int(a.size) * a.dtype.itemsize for a in operands)
    buf_bytes += M * L * 4                       # output
    buf_bytes += N * (H + 2) * L * 4             # halo-padded scratch
    buf_bytes += M * 3 * L * 4                   # im2row scratch
    vmem_limit = min(64 * 1024 * 1024, max(4 * buf_bytes + (2 << 20), 8 << 20))

    return pl.pallas_call(
        resblock_kernel,
        out_shape=jax.ShapeDtypeStruct((N, H, L), x_ls.dtype),
        in_specs=[vmem] * 8,
        out_specs=vmem,
        scratch_shapes=[pltpu.VMEM((N, H + 2, L), jnp.float32),
                        pltpu.VMEM((M, 3 * L), jnp.float32)],
        compiler_params=pltpu.CompilerParams(vmem_limit_bytes=vmem_limit),
    )(*operands)


def residual_block(x_nchw, p):
    # PyTorch-shaped convenience entry point (NCHW in, NCHW out).
    N, C, H, W = x_nchw.shape
    fp = fold_params(p, N, C, H, W)
    x_ls = jnp.transpose(x_nchw, (0, 2, 3, 1)).reshape(N, H, W * C)
    out_ls = residual_block_lanedense(x_ls, fp)
    return jnp.transpose(out_ls.reshape(N, H, W, C), (0, 3, 1, 2))


def reference(x_nchw, p):
    # pure-JAX reference of the PyTorch forward (training-mode BN, with biases)
    x = jnp.transpose(x_nchw, (0, 2, 3, 1))

    def conv(v, w, b):
        return lax.conv_general_dilated(
            v, w, window_strides=(1, 1), padding='SAME',
            dimension_numbers=('NHWC', 'HWIO', 'NHWC')) + b

    def bn(v, g, b):
        mean = v.mean(axis=(0, 1, 2))
        var = ((v - mean) ** 2).mean(axis=(0, 1, 2))
        return (v - mean) / jnp.sqrt(var + EPS) * g + b

    y = conv(x, p['w1'], p['b1'])
    y = bn(y, p['g1'], p['be1'])
    y = jnp.where(y > 0, y, NEG_SLOPE * y)
    y = conv(y, p['w2'], p['b2'])
    y = bn(y, p['g2'], p['be2'])
    return jnp.transpose(x + y, (0, 3, 1, 2))


if __name__ == "__main__":
    N, C, H, W = 2, 8, 16, 16   # W*C = 128 -> exactly one dense lane tile
    key = jax.random.PRNGKey(0)
    ks = jax.random.split(key, 9)

    fan_in = 3 * 3 * C
    params = {
        'w1': jax.random.normal(ks[0], (3, 3, C, C), jnp.float32) / jnp.sqrt(fan_in),
        'b1': 0.1 * jax.random.normal(ks[1], (C,), jnp.float32),
        'g1': 1.0 + 0.1 * jax.random.normal(ks[2], (C,), jnp.float32),
        'be1': 0.1 * jax.random.normal(ks[3], (C,), jnp.float32),
        'w2': jax.random.normal(ks[4], (3, 3, C, C), jnp.float32) / jnp.sqrt(fan_in),
        'b2': 0.1 * jax.random.normal(ks[5], (C,), jnp.float32),
        'g2': 1.0 + 0.1 * jax.random.normal(ks[6], (C,), jnp.float32),
        'be2': 0.1 * jax.random.normal(ks[7], (C,), jnp.float32),
    }
    x = jax.random.normal(ks[8], (N, C, H, W), jnp.float32)

    out = jax.block_until_ready(residual_block(x, params))
    ref = jax.block_until_ready(reference(x, params))

    assert out.shape == (N, C, H, W) and out.dtype == jnp.float32
    err = jnp.max(jnp.abs(out - ref))
    assert jnp.allclose(out, ref, rtol=1e-4, atol=1e-4), f"max err {err}"

    print("KERNEL_OK")
</pallas_src>

<mosaic_0001>
module attributes {stable_mosaic.version = 11 : i64} {
  func.func @resblock_kernel(%arg0: memref<2x16x128xf32, #tpu.memory_space<vmem>>, %arg1: memref<384x128xf32, #tpu.memory_space<vmem>>, %arg2: memref<384x128xf32, #tpu.memory_space<vmem>>, %arg3: memref<1x128xf32, #tpu.memory_space<vmem>>, %arg4: memref<1x128xf32, #tpu.memory_space<vmem>>, %arg5: memref<1x128xf32, #tpu.memory_space<vmem>>, %arg6: memref<1x128xf32, #tpu.memory_space<vmem>>, %arg7: memref<128x128xf32, #tpu.memory_space<vmem>>, %arg8: memref<2x16x128xf32, #tpu.memory_space<vmem>>, %arg9: memref<2x18x128xf32, #tpu.memory_space<vmem>>, %arg10: memref<32x384xf32, #tpu.memory_space<vmem>>) attributes {dimension_semantics = [], scalar_prefetch = 0 : i64, scratch_operands = 2 : i64, tpu.core_type = #tpu.core_type<tc>} {
    %cst = arith.constant 0.000000e+00 : f32
    %0 = vector.broadcast %cst : f32 to vector<2x1x128xf32>
    %c0 = arith.constant 0 : index
    %c0_0 = arith.constant 0 : index
    %c0_1 = arith.constant 0 : index
    %1 = vector.load %arg9[%c0, %c0_0, %c0_1] : memref<2x18x128xf32, #tpu.memory_space<vmem>>, vector<2x1x128xf32>
    tpu.vector_store %arg9[%c0, %c0_0, %c0_1], %0 {strides = array<i32>} : memref<2x18x128xf32, #tpu.memory_space<vmem>>, vector<2x1x128xf32>,
    %c0_2 = arith.constant 0 : index
    %c17 = arith.constant 17 : index
    %c0_3 = arith.constant 0 : index
    %2 = vector.load %arg9[%c0_2, %c17, %c0_3] : memref<2x18x128xf32, #tpu.memory_space<vmem>>, vector<2x1x128xf32>
    tpu.vector_store %arg9[%c0_2, %c17, %c0_3], %0 {strides = array<i32>} : memref<2x18x128xf32, #tpu.memory_space<vmem>>, vector<2x1x128xf32>,
    %c0_4 = arith.constant 0 : index
    %c0_5 = arith.constant 0 : index
    %c0_6 = arith.constant 0 : index
    %3 = vector.load %arg0[%c0_4, %c0_5, %c0_6] : memref<2x16x128xf32, #tpu.memory_space<vmem>>, vector<2x16x128xf32>
    %c0_7 = arith.constant 0 : index
    %c1 = arith.constant 1 : index
    %c0_8 = arith.constant 0 : index
    %4 = vector.load %arg9[%c0_7, %c1, %c0_8] : memref<2x18x128xf32, #tpu.memory_space<vmem>>, vector<2x16x128xf32>
    tpu.vector_store %arg9[%c0_7, %c1, %c0_8], %3 {strides = array<i32>} : memref<2x18x128xf32, #tpu.memory_space<vmem>>, vector<2x16x128xf32>,
    %c0_9 = arith.constant 0 : index
    %c0_10 = arith.constant 0 : index
    %c0_11 = arith.constant 0 : index
    %5 = vector.load %arg9[%c0_9, %c0_10, %c0_11] : memref<2x18x128xf32, #tpu.memory_space<vmem>>, vector<2x16x128xf32>
    %6 = vector.shape_cast %5 : vector<2x16x128xf32> to vector<32x128xf32>
    %c0_12 = arith.constant 0 : index
    %c0_13 = arith.constant 0 : index
    %7 = vector.load %arg10[%c0_12, %c0_13] : memref<32x384xf32, #tpu.memory_space<vmem>>, vector<32x128xf32>
    tpu.vector_store %arg10[%c0_12, %c0_13], %6 {strides = array<i32>} : memref<32x384xf32, #tpu.memory_space<vmem>>, vector<32x128xf32>,
    %c0_14 = arith.constant 0 : index
    %c1_15 = arith.constant 1 : index
    %c0_16 = arith.constant 0 : index
    %8 = vector.load %arg9[%c0_14, %c1_15, %c0_16] : memref<2x18x128xf32, #tpu.memory_space<vmem>>, vector<2x16x128xf32>
    %9 = vector.shape_cast %8 : vector<2x16x128xf32> to vector<32x128xf32>
    %c0_17 = arith.constant 0 : index
    %c128 = arith.constant 128 : index
    %10 = vector.load %arg10[%c0_17, %c128] : memref<32x384xf32, #tpu.memory_space<vmem>>, vector<32x128xf32>
    tpu.vector_store %arg10[%c0_17, %c128], %9 {strides = array<i32>} : memref<32x384xf32, #tpu.memory_space<vmem>>, vector<32x128xf32>,
    %c0_18 = arith.constant 0 : index
    %c2 = arith.constant 2 : index
    %c0_19 = arith.constant 0 : index
    %11 = vector.load %arg9[%c0_18, %c2, %c0_19] : memref<2x18x128xf32, #tpu.memory_space<vmem>>, vector<2x16x128xf32>
    %12 = vector.shape_cast %11 : vector<2x16x128xf32> to vector<32x128xf32>
    %c0_20 = arith.constant 0 : index
    %c256 = arith.constant 256 : index
    %13 = vector.load %arg10[%c0_20, %c256] : memref<32x384xf32, #tpu.memory_space<vmem>>, vector<32x128xf32>
    tpu.vector_store %arg10[%c0_20, %c256], %12 {strides = array<i32>} : memref<32x384xf32, #tpu.memory_space<vmem>>, vector<32x128xf32>,
    %c0_21 = arith.constant 0 : index
    %c0_22 = arith.constant 0 : index
    %14 = vector.load %arg10[%c0_21, %c0_22] : memref<32x384xf32, #tpu.memory_space<vmem>>, vector<32x384xf32>
    %c0_23 = arith.constant 0 : index
    %c0_24 = arith.constant 0 : index
    %15 = vector.load %arg1[%c0_23, %c0_24] : memref<384x128xf32, #tpu.memory_space<vmem>>, vector<384x128xf32>
    %cst_25 = arith.constant dense<0.000000e+00> : vector<32x128xf32>
    %16 = tpu.matmul %14, %15, %cst_25 {dimension_numbers = #tpu.dot_dimension_numbers<[1], [0], [0], [1], [0, 0, 1, 1], [], []>} : vector<32x384xf32>, vector<384x128xf32>, vector<32x128xf32> -> vector<32x128xf32>
    %cst_26 = arith.constant dense<0.000000e+00> : vector<128xf32>
    %17 = vector.multi_reduction <add>, %16, %cst_26 [0] : vector<32x128xf32> to vector<128xf32>
    %18 = vector.shape_cast %17 : vector<128xf32> to vector<1x128xf32>
    %19 = arith.mulf %16, %16 : vector<32x128xf32>
    %cst_27 = arith.constant dense<0.000000e+00> : vector<128xf32>
    %20 = vector.multi_reduction <add>, %19, %cst_27 [0] : vector<32x128xf32> to vector<128xf32>
    %21 = vector.shape_cast %20 : vector<128xf32> to vector<1x128xf32>
    %22 = tpu.concatenate %18, %21 in 0 : vector<1x128xf32>, vector<1x128xf32> -> vector<2x128xf32>
    %c0_28 = arith.constant 0 : index
    %c0_29 = arith.constant 0 : index
    %23 = vector.load %arg7[%c0_28, %c0_29] : memref<128x128xf32, #tpu.memory_space<vmem>>, vector<128x128xf32>
    %cst_30 = arith.constant dense<0.000000e+00> : vector<2x128xf32>
    %24 = tpu.matmul %22, %23, %cst_30 {dimension_numbers = #tpu.dot_dimension_numbers<[1], [0], [0], [1], [0, 0, 1, 1], [], []>} : vector<2x128xf32>, vector<128x128xf32>, vector<2x128xf32> -> vector<2x128xf32>
    %25 = vector.extract_strided_slice %24 {offsets = [0, 0], sizes = [1, 128], strides = [1, 1]} : vector<2x128xf32> to vector<1x128xf32>
    %26 = vector.extract_strided_slice %24 {offsets = [1, 0], sizes = [1, 128], strides = [1, 1]} : vector<2x128xf32> to vector<1x128xf32>
    %27 = arith.mulf %25, %25 : vector<1x128xf32>
    %28 = arith.subf %26, %27 : vector<1x128xf32>
    %c0_31 = arith.constant 0 : index
    %c0_32 = arith.constant 0 : index
    %29 = vector.load %arg3[%c0_31, %c0_32] : memref<1x128xf32, #tpu.memory_space<vmem>>, vector<1x128xf32>
    %cst_33 = arith.constant 9.99999974E-6 : f32
    %30 = vector.broadcast %cst_33 : f32 to vector<1x128xf32>
    %31 = arith.addf %28, %30 : vector<1x128xf32>
    %32 = math.rsqrt %31 : vector<1x128xf32>
    %33 = arith.mulf %29, %32 : vector<1x128xf32>
    %c0_34 = arith.constant 0 : index
    %c0_35 = arith.constant 0 : index
    %34 = vector.load %arg4[%c0_34, %c0_35] : memref<1x128xf32, #tpu.memory_space<vmem>>, vector<1x128xf32>
    %35 = arith.mulf %25, %33 : vector<1x128xf32>
    %36 = arith.subf %34, %35 : vector<1x128xf32>
    %37 = vector.broadcast %33 : vector<1x128xf32> to vector<32x128xf32>
    %38 = arith.mulf %16, %37 : vector<32x128xf32>
    %39 = vector.broadcast %36 : vector<1x128xf32> to vector<32x128xf32>
    %40 = arith.addf %38, %39 : vector<32x128xf32>
    %cst_36 = arith.constant 2.000000e-01 : f32
    %41 = vector.broadcast %cst_36 : f32 to vector<32x128xf32>
    %42 = arith.mulf %41, %40 : vector<32x128xf32>
    %43 = arith.maximumf %40, %42 : vector<32x128xf32>
    %44 = vector.shape_cast %43 : vector<32x128xf32> to vector<2x16x128xf32>
    %c0_37 = arith.constant 0 : index
    %c1_38 = arith.constant 1 : index
    %c0_39 = arith.constant 0 : index
    %45 = vector.load %arg9[%c0_37, %c1_38, %c0_39] : memref<2x18x128xf32, #tpu.memory_space<vmem>>, vector<2x16x128xf32>
    tpu.vector_store %arg9[%c0_37, %c1_38, %c0_39], %44 {strides = array<i32>} : memref<2x18x128xf32, #tpu.memory_space<vmem>>, vector<2x16x128xf32>,
    %c0_40 = arith.constant 0 : index
    %c0_41 = arith.constant 0 : index
    %c0_42 = arith.constant 0 : index
    %46 = vector.load %arg9[%c0_40, %c0_41, %c0_42] : memref<2x18x128xf32, #tpu.memory_space<vmem>>, vector<2x16x128xf32>
    %47 = vector.shape_cast %46 : vector<2x16x128xf32> to vector<32x128xf32>
    %c0_43 = arith.constant 0 : index
    %c0_44 = arith.constant 0 : index
    %48 = vector.load %arg10[%c0_43, %c0_44] : memref<32x384xf32, #tpu.memory_space<vmem>>, vector<32x128xf32>
    tpu.vector_store %arg10[%c0_43, %c0_44], %47 {strides = array<i32>} : memref<32x384xf32, #tpu.memory_space<vmem>>, vector<32x128xf32>,
    %c0_45 = arith.constant 0 : index
    %c1_46 = arith.constant 1 : index
    %c0_47 = arith.constant 0 : index
    %49 = vector.load %arg9[%c0_45, %c1_46, %c0_47] : memref<2x18x128xf32, #tpu.memory_space<vmem>>, vector<2x16x128xf32>
    %50 = vector.shape_cast %49 : vector<2x16x128xf32> to vector<32x128xf32>
    %c0_48 = arith.constant 0 : index
    %c128_49 = arith.constant 128 : index
    %51 = vector.load %arg10[%c0_48, %c128_49] : memref<32x384xf32, #tpu.memory_space<vmem>>, vector<32x128xf32>
    tpu.vector_store %arg10[%c0_48, %c128_49], %50 {strides = array<i32>} : memref<32x384xf32, #tpu.memory_space<vmem>>, vector<32x128xf32>,
    %c0_50 = arith.constant 0 : index
    %c2_51 = arith.constant 2 : index
    %c0_52 = arith.constant 0 : index
    %52 = vector.load %arg9[%c0_50, %c2_51, %c0_52] : memref<2x18x128xf32, #tpu.memory_space<vmem>>, vector<2x16x128xf32>
    %53 = vector.shape_cast %52 : vector<2x16x128xf32> to vector<32x128xf32>
    %c0_53 = arith.constant 0 : index
    %c256_54 = arith.constant 256 : index
    %54 = vector.load %arg10[%c0_53, %c256_54] : memref<32x384xf32, #tpu.memory_space<vmem>>, vector<32x128xf32>
    tpu.vector_store %arg10[%c0_53, %c256_54], %53 {strides = array<i32>} : memref<32x384xf32, #tpu.memory_space<vmem>>, vector<32x128xf32>,
    %c0_55 = arith.constant 0 : index
    %c0_56 = arith.constant 0 : index
    %55 = vector.load %arg10[%c0_55, %c0_56] : memref<32x384xf32, #tpu.memory_space<vmem>>, vector<32x384xf32>
    %c0_57 = arith.constant 0 : index
    %c0_58 = arith.constant 0 : index
    %56 = vector.load %arg2[%c0_57, %c0_58] : memref<384x128xf32, #tpu.memory_space<vmem>>, vector<384x128xf32>
    %cst_59 = arith.constant dense<0.000000e+00> : vector<32x128xf32>
    %57 = tpu.matmul %55, %56, %cst_59 {dimension_numbers = #tpu.dot_dimension_numbers<[1], [0], [0], [1], [0, 0, 1, 1], [], []>} : vector<32x384xf32>, vector<384x128xf32>, vector<32x128xf32> -> vector<32x128xf32>
    %cst_60 = arith.constant dense<0.000000e+00> : vector<128xf32>
    %58 = vector.multi_reduction <add>, %57, %cst_60 [0] : vector<32x128xf32> to vector<128xf32>
    %59 = vector.shape_cast %58 : vector<128xf32> to vector<1x128xf32>
    %60 = arith.mulf %57, %57 : vector<32x128xf32>
    %cst_61 = arith.constant dense<0.000000e+00> : vector<128xf32>
    %61 = vector.multi_reduction <add>, %60, %cst_61 [0] : vector<32x128xf32> to vector<128xf32>
    %62 = vector.shape_cast %61 : vector<128xf32> to vector<1x128xf32>
    %63 = tpu.concatenate %59, %62 in 0 : vector<1x128xf32>, vector<1x128xf32> -> vector<2x128xf32>
    %c0_62 = arith.constant 0 : index
    %c0_63 = arith.constant 0 : index
    %64 = vector.load %arg7[%c0_62, %c0_63] : memref<128x128xf32, #tpu.memory_space<vmem>>, vector<128x128xf32>
    %cst_64 = arith.constant dense<0.000000e+00> : vector<2x128xf32>
    %65 = tpu.matmul %63, %64, %cst_64 {dimension_numbers = #tpu.dot_dimension_numbers<[1], [0], [0], [1], [0, 0, 1, 1], [], []>} : vector<2x128xf32>, vector<128x128xf32>, vector<2x128xf32> -> vector<2x128xf32>
    %66 = vector.extract_strided_slice %65 {offsets = [0, 0], sizes = [1, 128], strides = [1, 1]} : vector<2x128xf32> to vector<1x128xf32>
    %67 = vector.extract_strided_slice %65 {offsets = [1, 0], sizes = [1, 128], strides = [1, 1]} : vector<2x128xf32> to vector<1x128xf32>
    %68 = arith.mulf %66, %66 : vector<1x128xf32>
    %69 = arith.subf %67, %68 : vector<1x128xf32>
    %c0_65 = arith.constant 0 : index
    %c0_66 = arith.constant 0 : index
    %70 = vector.load %arg5[%c0_65, %c0_66] : memref<1x128xf32, #tpu.memory_space<vmem>>, vector<1x128xf32>
    %cst_67 = arith.constant 9.99999974E-6 : f32
    %71 = vector.broadcast %cst_67 : f32 to vector<1x128xf32>
    %72 = arith.addf %69, %71 : vector<1x128xf32>
    %73 = math.rsqrt %72 : vector<1x128xf32>
    %74 = arith.mulf %70, %73 : vector<1x128xf32>
    %c0_68 = arith.constant 0 : index
    %c0_69 = arith.constant 0 : index
    %75 = vector.load %arg6[%c0_68, %c0_69] : memref<1x128xf32, #tpu.memory_space<vmem>>, vector<1x128xf32>
    %76 = arith.mulf %66, %74 : vector<1x128xf32>
    %77 = arith.subf %75, %76 : vector<1x128xf32>
    %78 = vector.broadcast %74 : vector<1x128xf32> to vector<32x128xf32>
    %79 = arith.mulf %57, %78 : vector<32x128xf32>
    %80 = vector.broadcast %77 : vector<1x128xf32> to vector<32x128xf32>
    %81 = arith.addf %79, %80 : vector<32x128xf32>
    %c0_70 = arith.constant 0 : index
    %c0_71 = arith.constant 0 : index
    %c0_72 = arith.constant 0 : index
    %82 = vector.load %arg0[%c0_70, %c0_71, %c0_72] : memref<2x16x128xf32, #tpu.memory_space<vmem>>, vector<2x16x128xf32>
    %83 = vector.shape_cast %81 : vector<32x128xf32> to vector<2x16x128xf32>
    %84 = arith.addf %82, %83 : vector<2x16x128xf32>
    %c0_73 = arith.constant 0 : index
    %c0_74 = arith.constant 0 : index
    %c0_75 = arith.constant 0 : index
    %85 = vector.load %arg8[%c0_73, %c0_74, %c0_75] : memref<2x16x128xf32, #tpu.memory_space<vmem>>, vector<2x16x128xf32>
    tpu.vector_store %arg8[%c0_73, %c0_74, %c0_75], %84 {strides = array<i32>} : memref<2x16x128xf32, #tpu.memory_space<vmem>>, vector<2x16x128xf32>,
    return
  }
}

</mosaic_0001>

<bundles_post_ra>
// kernel: tpu_custom_call.1
= control target key start
LH: loop header
LB: loop body
LE: loop exit
PB: predicated region body
PF: predicated region fallthrough
CT: control target
= control target key end

     0   :  { %13 = vsyncpa [#allocation5], 0  ;;  %s978_s0 = inlined_call_operand.hbm [shape: f32[2,16,128], index: 0, kind: input, shape index: {}]   ;;  %s979_s1 = inlined_call_operand.hbm [shape: f32[384,128], index: 1, kind: input, shape index: {}]   ;;  %s980_s2 = inlined_call_operand.hbm [shape: f32[384,128], index: 2, kind: input, shape index: {}]   ;;  %s981_s3 = inlined_call_operand.vmem [shape: f32[1,128], index: 3, kind: input, shape index: {}]   ;;  %s982_s4 = inlined_call_operand.vmem [shape: f32[1,128], index: 4, kind: input, shape index: {}]   ;;  %s983_s5 = inlined_call_operand.vmem [shape: f32[1,128], index: 5, kind: input, shape index: {}]   ;;  %s984_s6 = inlined_call_operand.vmem [shape: f32[1,128], index: 6, kind: input, shape index: {}]   ;;  %s985_s7 = inlined_call_operand.hbm [shape: f32[128,128], index: 7, kind: input, shape index: {}]   ;;  %s986_s8 = inlined_call_operand.hbm [shape: f32[2,16,128], index: 8, kind: output, shape index: {}]  }
   0x1   :  { %14 = vsyncpa [#allocation8], 0 }
   0x2   :  { %15 = vsyncpa [#allocation11], 0 }
   0x3   :  { %16 = vsyncpa [#allocation6], 0  ;;  %s34_s29 = sshll.u32 %s979_s1, 4  ;;  %s831_s30 = smov [#allocation7]   ;;  %s35_s29 = int_to_ptr.hbm [resolvable:$true] %s34_s29 }
   0x4   :  { %s36_s9 = sshll.u32 %s831_s30, 4  ;;  %s21_s12 = sshll.u32 %s978_s0, 4  ;;  %s37_s9 = int_to_ptr.vmem [resolvable:$true] %s36_s9  ;;  %s22_s12 = int_to_ptr.hbm [resolvable:$true] %s21_s12 }
   0x5   :  { %s832_s13 = smov 128   ;;  %s833_s14 = smov 8  }
   0x6   :  { %42 = dma.hbm_to_vmem [thread:$0]  %s35_s29, 6144, %s37_s9, [#allocation8], %s832_s13, %s832_s13, %s833_s14  }
   0x7   :  { %s834_s15 = smov [#allocation4]   ;;  %s47_s1 = sshll.u32 %s980_s2, 4  ;;  %s48_s1 = int_to_ptr.hbm [resolvable:$true] %s47_s1 }
   0x8   :  { %s23_s16 = sshll.u32 %s834_s15, 4  ;;  %s68_s20 = sshll.u32 %s985_s7, 4  ;;  %s24_s16 = int_to_ptr.vmem [resolvable:$true] %s23_s16  ;;  %s69_s20 = int_to_ptr.hbm [resolvable:$true] %s68_s20 }
   0x9   :  { %29 = dma.hbm_to_vmem [thread:$0]  %s22_s12, 512, %s24_s16, [#allocation5], %s832_s13, %s832_s13, %s833_s14  }
   0xa   :  { %s835_s21 = smov [#allocation9]   ;;  %s836_s23 = smov [#allocation10]  }
   0xb   :  { %s49_s22 = sshll.u32 %s835_s21, 4  ;;  %s70_s2 = sshll.u32 %s836_s23, 4  ;;  %s50_s22 = int_to_ptr.vmem [resolvable:$true] %s49_s22  ;;  %s71_s2 = int_to_ptr.vmem [resolvable:$true] %s70_s2 }
   0xc   :  { %55 = dma.hbm_to_vmem [thread:$0]  %s48_s1, 6144, %s50_s22, [#allocation8], %s832_s13, %s832_s13, %s833_s14  }
   0xd   :  { %76 = dma.hbm_to_vmem [thread:$0]  %s69_s20, 2048, %s71_s2, [#allocation11], %s832_s13, %s832_s13, %s833_s14  }
   0xe   :  { %823 = dma.done.wait [#allocation5], 512  }
   0xf   :  { %824 = vsyncadd [#allocation5], 4294966784 }
  0x10   :  { %825 = dma.done.wait [#allocation8], 12288  }
  0x11   :  { %826 = vsyncadd [#allocation8], 4294955008 }
  0x12   :  { %827 = dma.done.wait [#allocation11], 2048  }
  0x13   :  { %828 = vsyncadd [#allocation11], 4294965248  ;;  %v837_v0 = vmov 0.0   ;;  %v188_v1 = vld [vmem:[#allocation7 + $0x178] sm:$0xff]  ;;  %v187_v2 = vld [vmem:[#allocation7 + $0x170] sm:$0xff]  ;;  %vm298_vm0 = vcmask 1040384  }
  0x14   :  { %93 = vst [vmem:[#allocation2] sm:$0x1] %v837_v0  ;;  %v156_v3 = vld [vmem:[#allocation7 + $0x78] sm:$0xff]  ;;  %247 = vmatpush.msra.mxu2 %v188_v1  ;;  %v155_v5 = vld [vmem:[#allocation7 + $0x70] sm:$0xff]  ;;  %v186_v6 = vld [vmem:[#allocation7 + $0x168] sm:$0xff]  ;;  %s676_s9 = sshll.u32 %s986_s8, 4  ;;  %s677_s9 = int_to_ptr.hbm [resolvable:$true] %s676_s9 }
  0x15   :  { %94 = vst [vmem:[#allocation2 + $0x18] sm:$0x1] %v837_v0  ;;  %189 = vmatpush.msra.mxu0 %v156_v3  ;;  %v172_v4 = vld [vmem:[#allocation7 + $0xf8] sm:$0xff]  ;;  %v171_v7 = vld [vmem:[#allocation7 + $0xf0] sm:$0xff]  ;;  %v154_v8 = vld [vmem:[#allocation7 + $0x68] sm:$0xff] }
  0x16   :  { %95 = vst [vmem:[#allocation2 + $0x11] sm:$0x1] %v837_v0  ;;  %218 = vmatpush.msra.mxu1 %v172_v4  ;;  %248 = vmatpush.msra.mxu2 %v187_v2  ;;  %v170_v9 = vld [vmem:[#allocation7 + $0xe8] sm:$0xff]  ;;  %v185_v10 = vld [vmem:[#allocation7 + $0x160] sm:$0xff]  ;;  %v184_v13 = vld [vmem:[#allocation7 + $0x158] sm:$0xff] }
  0x17   :  { %96 = vst [vmem:[#allocation2 + $0x29] sm:$0x1] %v837_v0  ;;  %190 = vmatpush.msra.mxu0 %v155_v5  ;;  %v153_v11 = vld [vmem:[#allocation7 + $0x60] sm:$0xff]  ;;  %v152_v14 = vld [vmem:[#allocation7 + $0x58] sm:$0xff]  ;;  %v183_v16 = vld [vmem:[#allocation7 + $0x150] sm:$0xff] }
  0x18   :  { %219 = vmatpush.msra.mxu1 %v171_v7  ;;  %249 = vmatpush.msra.mxu2 %v186_v6  ;;  %v169_v12 = vld [vmem:[#allocation7 + $0xe0] sm:$0xff]  ;;  %v168_v15 = vld [vmem:[#allocation7 + $0xd8] sm:$0xff]  ;;  %v151_v17 = vld [vmem:[#allocation7 + $0x50] sm:$0xff] }
  0x19   :  { %191 = vmatpush.msra.mxu0 %v154_v8  ;;  %v167_v18 = vld [vmem:[#allocation7 + $0xd0] sm:$0xff]  ;;  %v182_v19 = vld [vmem:[#allocation7 + $0x148] sm:$0xff]  ;;  %v181_v22 = vld [vmem:[#allocation7 + $0x140] sm:$0xff] }
  0x1a   :  { %220 = vmatpush.msra.mxu1 %v170_v9  ;;  %250 = vmatpush.msra.mxu2 %v185_v10  ;;  %v150_v20 = vld [vmem:[#allocation7 + $0x48] sm:$0xff]  ;;  %v149_v23 = vld [vmem:[#allocation7 + $0x40] sm:$0xff]  ;;  %v180_v25 = vld [vmem:[#allocation7 + $0x138] sm:$0xff] }
  0x1b   :  { %192 = vmatpush.msra.mxu0 %v153_v11  ;;  %v166_v21 = vld [vmem:[#allocation7 + $0xc8] sm:$0xff]  ;;  %v165_v24 = vld [vmem:[#allocation7 + $0xc0] sm:$0xff]  ;;  %v148_v26 = vld [vmem:[#allocation7 + $0x38] sm:$0xff] }
  0x1c   :  { %221 = vmatpush.msra.mxu1 %v169_v12  ;;  %251 = vmatpush.msra.mxu2 %v184_v13  ;;  %v908_v27 = vld [vmem:[#allocation4] sm:$0xff]  ;;  %v164_v28 = vld [vmem:[#allocation7 + $0xb8] sm:$0xff]  ;;  %v910_v29 = vld [vmem:[#allocation4 + $0x8] sm:$0xff] }
  0x1d   :  { %193 = vmatpush.msra.mxu0 %v152_v14  ;;  %101 = vst [vmem:[#allocation2 + $0x1] sm:$0xff] %v908_v27  ;;  %v179_v30 = vld [vmem:[#allocation7 + $0x130] sm:$0xff]  ;;  %v916_v34 = vld [vmem:[#allocation4 + $0x18] sm:$0xff]  ;;  %v178_v35 = vld [vmem:[#allocation7 + $0x128] sm:$0xff] }
  0x1e   :  { %222 = vmatpush.msra.mxu1 %v168_v15  ;;  %252 = vmatpush.msra.mxu2 %v183_v16  ;;  %v147_v31 = vld [vmem:[#allocation7 + $0x30] sm:$0xff]  ;;  %102 = vst [vmem:[#allocation2 + $0x9] sm:$0xff] %v910_v29  ;;  %v146_v36 = vld [vmem:[#allocation7 + $0x28] sm:$0xff]  ;;  %v177_v38 = vld [vmem:[#allocation7 + $0x120] sm:$0xff] }
  0x1f   :  { %194 = vmatpush.msra.mxu0 %v151_v17  ;;  %v914_v32 = vld [vmem:[#allocation4 + $0x10] sm:$0xff]  ;;  %104 = vst [vmem:[#allocation2 + $0x21] sm:$0xff] %v916_v34  ;;  %v162_v37 = vld [vmem:[#allocation7 + $0xa8] sm:$0xff]  ;;  %v145_v39 = vld [vmem:[#allocation7 + $0x20] sm:$0xff] }
  0x20   :  { %223 = vmatpush.msra.mxu1 %v167_v18  ;;  %253 = vmatpush.msra.mxu2 %v182_v19  ;;  %v163_v33 = vld [vmem:[#allocation7 + $0xb0] sm:$0xff]  ;;  %103 = vst [vmem:[#allocation2 + $0x19] sm:$0xff] %v914_v32  ;;  %v161_v40 = vld [vmem:[#allocation7 + $0xa0] sm:$0xff]  ;;  %v176_v41 = vld [vmem:[#allocation7 + $0x118] sm:$0xff] }
  0x21   :  { %195 = vmatpush.msra.mxu0 %v150_v20  ;;  %v144_v42 = vld [vmem:[#allocation7 + $0x18] sm:$0xff]  ;;  %v175_v44 = vld [vmem:[#allocation7 + $0x110] sm:$0xff]  ;;  %v174_v47 = vld [vmem:[#allocation7 + $0x108] sm:$0xff] }
  0x22   :  { %224 = vmatpush.msra.mxu1 %v166_v21  ;;  %254 = vmatpush.msra.mxu2 %v181_v22  ;;  %v160_v43 = vld [vmem:[#allocation7 + $0x98] sm:$0xff]  ;;  %v143_v45 = vld [vmem:[#allocation7 + $0x10] sm:$0xff]  ;;  %v142_v48 = vld [vmem:[#allocation7 + $0x8] sm:$0xff] }
  0x23   :  { %196 = vmatpush.msra.mxu0 %v149_v23  ;;  %v159_v46 = vld [vmem:[#allocation7 + $0x90] sm:$0xff]  ;;  %v158_v49 = vld [vmem:[#allocation7 + $0x88] sm:$0xff]  ;;  %v173_v50 = vld [vmem:[#allocation7 + $0x100] sm:$0xff] }
  0x24   :  { %225 = vmatpush.msra.mxu1 %v165_v24  ;;  %255 = vmatpush.msra.mxu2 %v180_v25  ;;  %v141_v51 = vld [vmem:[#allocation7] sm:$0xff]  ;;  %v105_v54 = vld [vmem:[#allocation2] sm:$0xff]  ;;  %v315_v61 = vld [vmem:[#allocation10 + $0x78] sm:$0xff] }
  0x25   :  { %197 = vmatpush.msra.mxu0 %v148_v26  ;;  %v121_v52 = vld [vmem:[#allocation2 + $0x2] sm:$0xff]  ;;  %v157_v53 = vld [vmem:[#allocation7 + $0x80] sm:$0xff]  ;;  %316 = vmatpush.msra.mxu3 %v315_v61  ;;  %v313_v63 = vld [vmem:[#allocation10 + $0x68] sm:$0xff] }
  0x26   :  { %226 = vmatpush.msra.mxu1 %v164_v28  ;;  %256 = vmatpush.msra.mxu2 %v179_v30  ;;  %v122_v55 = vld [vmem:[#allocation2 + $0xa] sm:$0xff]  ;;  %v124_v59 = vld [vmem:[#allocation2 + $0x22] sm:$0xff]  ;;  %v309_v3 = vld [vmem:[#allocation10 + $0x48] sm:$0xff] }
  0x27   :  { %198 = vmatpush.msra.mxu0 %v147_v31  ;;  %v106_v56 = vld [vmem:[#allocation2 + $0x8] sm:$0xff]  ;;  %v123_v57 = vld [vmem:[#allocation2 + $0x1a] sm:$0xff]  ;;  %v312_v0 = vld [vmem:[#allocation10 + $0x60] sm:$0xff] }
  0x28   :  { %227 = vmatpush.msra.mxu1 %v163_v33  ;;  %257 = vmatpush.msra.mxu2 %v178_v35  ;;  %v107_v58 = vld [vmem:[#allocation2 + $0x18] sm:$0xff]  ;;  %v108_v60 = vld [vmem:[#allocation2 + $0x20] sm:$0xff]  ;;  %v311_v1 = vld [vmem:[#allocation10 + $0x58] sm:$0xff] }
  0x29   :  { %199 = vmatpush.msra.mxu0 %v146_v36  ;;  %v314_v62 = vld [vmem:[#allocation10 + $0x70] sm:$0xff]  ;;  %v308_v4 = vld [vmem:[#allocation10 + $0x40] sm:$0xff]  ;;  %v307_v7 = vld [vmem:[#allocation10 + $0x38] sm:$0xff] }
  0x2a   :  { %228 = vmatpush.msra.mxu1 %v162_v37  ;;  %258 = vmatpush.msra.mxu2 %v177_v38  ;;  %v310_v2 = vld [vmem:[#allocation10 + $0x50] sm:$0xff]  ;;  %v305_v9 = vld [vmem:[#allocation10 + $0x28] sm:$0xff]  ;;  %v304_v11 = vld [vmem:[#allocation10 + $0x20] sm:$0xff] }
  0x2b   :  { %200 = vmatpush.msra.mxu0 %v145_v39  ;;  %317 = vmatpush.msra.mxu3 %v314_v62  ;;  %v306_v8 = vld [vmem:[#allocation10 + $0x30] sm:$0xff]  ;;  %v303_v12 = vld [vmem:[#allocation10 + $0x18] sm:$0xff]  ;;  %v301_v16 = vld [vmem:[#allocation10 + $0x8] sm:$0xff] }
  0x2c   :  { %229 = vmatpush.msra.mxu1 %v161_v40  ;;  %259 = vmatpush.msra.mxu2 %v176_v41  ;;  %v302_v15 = vld [vmem:[#allocation10 + $0x10] sm:$0xff]  ;;  %v300_v18 = vld [vmem:[#allocation10] sm:$0xff] }
  0x2d   :  { %201 = vmatpush.msra.mxu0 %v144_v42  ;;  %318 = vmatpush.msra.mxu3 %v313_v63 }
  0x2e   :  { %230 = vmatpush.msra.mxu1 %v160_v43  ;;  %260 = vmatpush.msra.mxu2 %v175_v44 }
  0x2f   :  { %202 = vmatpush.msra.mxu0 %v143_v45  ;;  %319 = vmatpush.msra.mxu3 %v312_v0 }
  0x30   :  { %231 = vmatpush.msra.mxu1 %v159_v46  ;;  %261 = vmatpush.msra.mxu2 %v174_v47 }
  0x31   :  { %203 = vmatpush.msra.mxu0 %v142_v48  ;;  %320 = vmatpush.msra.mxu3 %v311_v1 }
  0x32   :  { %232 = vmatpush.msra.mxu1 %v158_v49  ;;  %262 = vmatpush.msra.mxu2 %v173_v50 }
  0x33   :  { %204 = vmatpush.msra.mxu0 %v141_v51  ;;  %263 = vmatmul.f32.vlgmr.msra.gmra.mxu2 %v121_v52 }
  0x34   :  { %233 = vmatpush.msra.mxu1 %v157_v53  ;;  %205 = vmatmul.f32.vlgmr.msra.gmra.mxu0 %v105_v54 }
  0x35   :  { %234 = vmatmul.f32.vlgmr.msra.gmra.mxu1 %v908_v27  ;;  %321 = vmatpush.msra.mxu3 %v310_v2 }
  0x37   :  { %322 = vmatpush.msra.mxu3 %v309_v3 }
  0x39   :  { %323 = vmatpush.msra.mxu3 %v308_v4 }
  0x3b   :  { %266 = vmatmul.f32.gmra.mxu2 %v122_v55  ;;  %324 = vmatpush.msra.mxu3 %v307_v7 }
  0x3c   :  { %208 = vmatmul.f32.gmra.mxu0 %v106_v56 }
  0x3d   :  { %237 = vmatmul.f32.gmra.mxu1 %v910_v29  ;;  %325 = vmatpush.msra.mxu3 %v306_v8 }
  0x3f   :  { %326 = vmatpush.msra.mxu3 %v305_v9 }
  0x41   :  { %327 = vmatpush.msra.mxu3 %v304_v11 }
  0x43   :  { %269 = vmatmul.f32.gmra.mxu2 %v123_v57  ;;  %328 = vmatpush.msra.mxu3 %v303_v12 }
  0x44   :  { %211 = vmatmul.f32.gmra.mxu0 %v107_v58 }
  0x45   :  { %240 = vmatmul.f32.gmra.mxu1 %v914_v32  ;;  %329 = vmatpush.msra.mxu3 %v302_v15 }
  0x47   :  { %330 = vmatpush.msra.mxu3 %v301_v16 }
  0x49   :  { %331 = vmatpush.msra.mxu3 %v300_v18 }
  0x4b   :  { %272 = vmatmul.f32.gmra.mxu2 %v124_v59  ;;  %598 = vmatpush.msrb.mxu3 %v315_v61  ;;  %v454_v61 = vld [vmem:[#allocation9 + $0xf0] sm:$0xff] }
  0x4c   :  { %214 = vmatmul.f32.gmra.mxu0 %v108_v60  ;;  %v455_v60 = vld [vmem:[#allocation9 + $0xf8] sm:$0xff] }
  0x4d   :  { %243 = vmatmul.f32.gmra.mxu1 %v916_v34  ;;  %599 = vmatpush.msrb.mxu3 %v314_v62  ;;  %v453_v62 = vld [vmem:[#allocation9 + $0xe8] sm:$0xff] }
  0x4e   :  { %501 = vmatpush.msrb.mxu1 %v455_v60 }
  0x4f   :  { %600 = vmatpush.msrb.mxu3 %v313_v63  ;;  %v452_v63 = vld [vmem:[#allocation9 + $0xe0] sm:$0xff] }
  0x50   :  { %502 = vmatpush.msrb.mxu1 %v454_v61  ;;  %v456_v61 = vld [vmem:[#allocation9 + $0x100] sm:$0xff] }
  0x51   :  { %601 = vmatpush.msrb.mxu3 %v312_v0  ;;  %v471_v0 = vld [vmem:[#allocation9 + $0x178] sm:$0xff] }
  0x52   :  { %503 = vmatpush.msrb.mxu1 %v453_v62  ;;  %530 = vmatpush.msrb.mxu2 %v471_v0  ;;  %v424_v62 = vld [vmem:[#allocation9] sm:$0xff]  ;;  %v341_v0 = vld [vmem:[%s981_s3] sm:$0x1] }
  0x53   :  { %602 = vmatpush.msrb.mxu3 %v311_v1  ;;  %v439_v1 = vld [vmem:[#allocation9 + $0x78] sm:$0xff] }
  0x54   :  { %504 = vmatpush.msrb.mxu1 %v452_v63  ;;  %472 = vmatpush.msrb.mxu0 %v439_v1 }
  0x55   :  { %603 = vmatpush.msrb.mxu3 %v310_v2  ;;  %v451_v2 = vld [vmem:[#allocation9 + $0xd8] sm:$0xff] }
  0x56   :  { %505 = vmatpush.msrb.mxu1 %v451_v2 }
  0x57   :  { %604 = vmatpush.msrb.mxu3 %v309_v3  ;;  %v470_v3 = vld [vmem:[#allocation9 + $0x170] sm:$0xff] }
  0x58   :  { %531 = vmatpush.msrb.mxu2 %v470_v3  ;;  %v359_v3 = vld [vmem:[%s982_s4] sm:$0x1] }
  0x59   :  { %605 = vmatpush.msrb.mxu3 %v308_v4  ;;  %v438_v4 = vld [vmem:[#allocation9 + $0x70] sm:$0xff] }
  0x5a   :  { %473 = vmatpush.msrb.mxu0 %v438_v4 }
  0x5b   :  { %606 = vmatpush.msrb.mxu3 %v307_v7  ;;  %v469_v7 = vld [vmem:[#allocation9 + $0x168] sm:$0xff] }
  0x5c   :  { %532 = vmatpush.msrb.mxu2 %v469_v7 }
  0x5d   :  { %607 = vmatpush.msrb.mxu3 %v306_v8  ;;  %v437_v8 = vld [vmem:[#allocation9 + $0x68] sm:$0xff] }
  0x5e   :  { %474 = vmatpush.msrb.mxu0 %v437_v8 }
  0x5f   :  { %608 = vmatpush.msrb.mxu3 %v305_v9  ;;  %v449_v9 = vld [vmem:[#allocation9 + $0xc8] sm:$0xff] }
  0x61   :  { %609 = vmatpush.msrb.mxu3 %v304_v11  ;;  %v468_v11 = vld [vmem:[#allocation9 + $0x160] sm:$0xff] }
  0x62   :  { %533 = vmatpush.msrb.mxu2 %v468_v11 }
  0x63   :  { %610 = vmatpush.msrb.mxu3 %v303_v12  ;;  %v436_v12 = vld [vmem:[#allocation9 + $0x60] sm:$0xff] }
  0x64   :  { %475 = vmatpush.msrb.mxu0 %v436_v12 }
  0x65   :  { %611 = vmatpush.msrb.mxu3 %v302_v15  ;;  %v467_v15 = vld [vmem:[#allocation9 + $0x158] sm:$0xff] }
  0x66   :  { %534 = vmatpush.msrb.mxu2 %v467_v15 }
  0x67   :  { %612 = vmatpush.msrb.mxu3 %v301_v16  ;;  %v435_v16 = vld [vmem:[#allocation9 + $0x58] sm:$0xff] }
  0x68   :  { %476 = vmatpush.msrb.mxu0 %v435_v16 }
  0x69   :  { %613 = vmatpush.msrb.mxu3 %v300_v18 }
  0xb1   :  { %v206_v5 = vpop.f32.mrf.mxu0 }
  0xb2   :  { %v235_v6 = vpop.f32.mrf.mxu1 }
  0xb3   :  { %v236_v22 = vadd.f32 %v235_v6, %v206_v5  ;;  %v450_v5 = vld [vmem:[#allocation9 + $0xd0] sm:$0xff] }
  0xb4   :  { %506 = vmatpush.msrb.mxu1 %v450_v5 }
  0xb6   :  { %v264_v10 = vpop.f32.mrf.mxu2  ;;  %507 = vmatpush.msrb.mxu1 %v449_v9 }
  0xb7   :  { %v926_v26 = vadd.f32 %v264_v10, %v236_v22 }
  0xb9   :  { %v209_v13 = vpop.f32.mrf.mxu0  ;;  %v285_v36 = vmul.f32 %v926_v26, %v926_v26 }
  0xba   :  { %v238_v14 = vpop.f32.mrf.mxu1 }
  0xbb   :  { %v239_v21 = vadd.f32 %v238_v14, %v209_v13  ;;  %v448_v13 = vld [vmem:[#allocation9 + $0xc0] sm:$0xff] }
  0xbc   :  { %508 = vmatpush.msrb.mxu1 %v448_v13 }
  0xbe   :  { %v267_v17 = vpop.f32.mrf.mxu2 }
  0xbf   :  { %v924_v25 = vadd.f32 %v267_v17, %v239_v21  ;;  %v447_v17 = vld [vmem:[#allocation9 + $0xb8] sm:$0xff]  ;;  %v446_v21 = vld [vmem:[#allocation9 + $0xb0] sm:$0xff] }
  0xc0   :  { %509 = vmatpush.msrb.mxu1 %v447_v17 }
  0xc1   :  { %v212_v19 = vpop.f32.mrf.mxu0  ;;  %v286_v33 = vmul.f32 %v924_v25, %v924_v25  ;;  %v276_v37 = vadd.f32 %v924_v25, %v926_v26 }
  0xc2   :  { %v241_v20 = vpop.f32.mrf.mxu1  ;;  %510 = vmatpush.msrb.mxu1 %v446_v21 }
  0xc3   :  { %v242_v23 = vadd.f32 %v241_v20, %v212_v19  ;;  %v289_v40 = vadd.f32 %v286_v33, %v285_v36  ;;  %v466_v19 = vld [vmem:[#allocation9 + $0x150] sm:$0xff]  ;;  %v432_v33 = vld [vmem:[#allocation9 + $0x40] sm:$0xff]  ;;  %v463_v36 = vld [vmem:[#allocation9 + $0x138] sm:$0xff] }
  0xc4   :  { %v434_v20 = vld [vmem:[#allocation9 + $0x50] sm:$0xff]  ;;  %535 = vmatpush.msrb.mxu2 %v466_v19 }
  0xc5   :  { %477 = vmatpush.msrb.mxu0 %v434_v20 }
  0xc6   :  { %v270_v24 = vpop.f32.mrf.mxu2 }
  0xc7   :  { %v928_v28 = vadd.f32 %v270_v24, %v242_v23  ;;  %v465_v23 = vld [vmem:[#allocation9 + $0x148] sm:$0xff] }
  0xc8   :  { %v433_v24 = vld [vmem:[#allocation9 + $0x48] sm:$0xff]  ;;  %536 = vmatpush.msrb.mxu2 %v465_v23 }
  0xc9   :  { %v215_v30 = vpop.f32.mrf.mxu0  ;;  %v287_v38 = vmul.f32 %v928_v28, %v928_v28  ;;  %v277_v41 = vadd.f32 %v276_v37, %v928_v28  ;;  %478 = vmatpush.msrb.mxu0 %v433_v24  ;;  %v431_v37 = vld [vmem:[#allocation9 + $0x38] sm:$0xff] }
  0xca   :  { %v244_v31 = vpop.f32.mrf.mxu1 }
  0xcb   :  { %v245_v35 = vadd.f32 %v244_v31, %v215_v30  ;;  %v290_v43 = vadd.f32 %v289_v40, %v287_v38  ;;  %v445_v30 = vld [vmem:[#allocation9 + $0xa8] sm:$0xff]  ;;  %v464_v31 = vld [vmem:[#allocation9 + $0x140] sm:$0xff]  ;;  %479 = vmatpush.msrb.mxu0 %v432_v33  ;;  %v443_v38 = vld [vmem:[#allocation9 + $0x98] sm:$0xff] }
  0xcc   :  { %511 = vmatpush.msrb.mxu1 %v445_v30  ;;  %537 = vmatpush.msrb.mxu2 %v464_v31  ;;  %v430_v40 = vld [vmem:[#allocation9 + $0x30] sm:$0xff] }
  0xcd   :  { %480 = vmatpush.msrb.mxu0 %v431_v37 }
  0xce   :  { %v273_v39 = vpop.f32.mrf.mxu2  ;;  %538 = vmatpush.msrb.mxu2 %v463_v36 }
  0xcf   :  { %v939_v42 = vadd.f32 %v273_v39, %v245_v35  ;;  %v444_v35 = vld [vmem:[#allocation9 + $0xa0] sm:$0xff]  ;;  %v462_v39 = vld [vmem:[#allocation9 + $0x130] sm:$0xff]  ;;  %481 = vmatpush.msrb.mxu0 %v430_v40 }
  0xd0   :  { %512 = vmatpush.msrb.mxu1 %v444_v35  ;;  %539 = vmatpush.msrb.mxu2 %v462_v39 }
  0xd1   :  { %v278_v44 = vadd.f32 %v277_v41, %v939_v42  ;;  %v288_v45 = vmul.f32 %v939_v42, %v939_v42  ;;  %v442_v41 = vld [vmem:[#allocation9 + $0x90] sm:$0xff] }
  0xd2   :  { %513 = vmatpush.msrb.mxu1 %v443_v38 }
  0xd3   :  { %v279_v46 = vrot.slane %v278_v44, 4  ;;  %v291_v47 = vadd.f32 %v290_v43, %v288_v45  ;;  %v461_v45 = vld [vmem:[#allocation9 + $0x128] sm:$0xff] }
  0xd4   :  { %514 = vmatpush.msrb.mxu1 %v442_v41  ;;  %540 = vmatpush.msrb.mxu2 %v461_v45 }
  0xd5   :  { %v280_v48 = vadd.f32 %v279_v46, %v278_v44  ;;  %v292_v49 = vrot.slane %v291_v47, 4  ;;  %v429_v46 = vld [vmem:[#allocation9 + $0x28] sm:$0xff] }
  0xd6   :  { %482 = vmatpush.msrb.mxu0 %v429_v46 }
  0xd7   :  { %v281_v50 = vrot.slane %v280_v48, 2  ;;  %v293_v51 = vadd.f32 %v292_v49, %v291_v47  ;;  %v441_v47 = vld [vmem:[#allocation9 + $0x88] sm:$0xff]  ;;  %v460_v49 = vld [vmem:[#allocation9 + $0x120] sm:$0xff] }
  0xd8   :  { %515 = vmatpush.msrb.mxu1 %v441_v47  ;;  %541 = vmatpush.msrb.mxu2 %v460_v49 }
  0xd9   :  { %v282_v52 = vadd.f32 %v281_v50, %v280_v48  ;;  %v294_v53 = vrot.slane %v293_v51, 2  ;;  %v428_v50 = vld [vmem:[#allocation9 + $0x20] sm:$0xff] }
  0xda   :  { %483 = vmatpush.msrb.mxu0 %v428_v50 }
  0xdb   :  { %v283_v54 = vrot.slane %v282_v52, 1  ;;  %v295_v55 = vadd.f32 %v294_v53, %v293_v51  ;;  %v440_v51 = vld [vmem:[#allocation9 + $0x80] sm:$0xff]  ;;  %v459_v53 = vld [vmem:[#allocation9 + $0x118] sm:$0xff] }
  0xdc   :  { %516 = vmatpush.msrb.mxu1 %v440_v51  ;;  %542 = vmatpush.msrb.mxu2 %v459_v53 }
  0xdd   :  { %v296_v56 = vrot.slane %v295_v55, 1  ;;  %v284_v57 = vadd.f32 %v283_v54, %v282_v52  ;;  %v427_v54 = vld [vmem:[#allocation9 + $0x18] sm:$0xff] }
  0xde   :  { %484 = vmatpush.msrb.mxu0 %v427_v54 }
  0xdf   :  { %v297_v58 = vadd.f32 %v296_v56, %v295_v55  ;;  %v458_v55 = vld [vmem:[#allocation9 + $0x110] sm:$0xff] }
  0xe0   :  { %v426_v56 = vld [vmem:[#allocation9 + $0x10] sm:$0xff]  ;;  %543 = vmatpush.msrb.mxu2 %v458_v55 }
  0xe1   :  { %v299_v59 = vsel %vm298_vm0, %v284_v57, %v297_v58  ;;  %v457_v58 = vld [vmem:[#allocation9 + $0x108] sm:$0xff]  ;;  %485 = vmatpush.msrb.mxu0 %v426_v56 }
  0xe2   :  { %332 = vmatmul.f32.vlgmr.msra.gmra.mxu3 %v299_v59  ;;  %v425_v59 = vld [vmem:[#allocation9 + $0x8] sm:$0xff]  ;;  %544 = vmatpush.msrb.mxu2 %v457_v58 }
  0xe3   :  { %486 = vmatpush.msrb.mxu0 %v425_v59 }
  0xe4   :  { %545 = vmatpush.msrb.mxu2 %v456_v61 }
  0xe5   :  { %487 = vmatpush.msrb.mxu0 %v424_v62 }
 0x165   :  { %v945_v6 = vpop.f32.mrf.mxu3 }
 0x166   :  { %v336_v10 = vmul.f32 %v945_v6, %v945_v6 }
 0x168   :  { %v338_v14 = vrot.slane %v336_v10, 7 }
 0x16a   :  { %v340_v18 = vsub.f32 %v945_v6, %v338_v14 }
 0x16c   :  { %v342_v22 = vadd.f32 1e-05, %v340_v18 }
 0x16e   :  { %699 = vrsqrt.f32 %v342_v22  ;;  %vm349_vm2 = vweird.f32 %v342_v22 }
 0x174   :  { %v700_v43 = vpop.eup %699 }
 0x175   :  { %v344_v44 = vmul.f32 %v700_v43, %v342_v22  ;;  %vm350_vm1 = vweird.f32 %v700_v43 }
 0x176   :  { %vm351_vm3 = vmor %vm349_vm2, %vm350_vm1 }
 0x177   :  { %v345_v48 = vmul.f32 %v700_v43, %v344_v44 }
 0x179   :  { %v346_v52 = vmul.f32 0.5, %v345_v48 }
 0x17b   :  { %v347_v57 = vsub.f32 1.5, %v346_v52 }
 0x17d   :  { %v348_v60 = vmul.f32 %v700_v43, %v347_v57 }
 0x17f   :  { %v352_v63 = vsel %vm351_vm3, %v700_v43, %v348_v60 }
 0x180   :  { %354 = vst [vmem:[#allocation1] sm:$0xff] %v352_v63 }
 0x187   :  { %v356_v1 = vld [vmem:[#allocation1 + $0x1] ss:$9 sm:$0xff] }
 0x188   :  { %v358_v2 = vmul.f32 %v356_v1, %v341_v0 }
 0x18a   :  { %v360_v4 = vmul.f32 %v358_v2, %v945_v6  ;;  %v363_v5 = vperm.slane %v358_v2, 0 }
 0x18c   :  { %v361_v7 = vsub.f32 %v359_v3, %v360_v4  ;;  %v365_v8 = vmul.f32 %v363_v5, %v926_v26  ;;  %v366_v9 = vmul.f32 %v363_v5, %v924_v25  ;;  %v367_v10 = vmul.f32 %v363_v5, %v928_v28 }
 0x18d   :  { %v368_v11 = vmul.f32 %v363_v5, %v939_v42 }
 0x18e   :  { %v370_v12 = vperm.slane %v361_v7, 0 }
 0x190   :  { %v372_v13 = vadd.f32 %v370_v12, %v365_v8  ;;  %v373_v14 = vadd.f32 %v370_v12, %v366_v9  ;;  %v374_v15 = vadd.f32 %v370_v12, %v367_v10  ;;  %v375_v16 = vadd.f32 %v370_v12, %v368_v11 }
 0x192   :  { %v376_v17 = vmul.f32 0.2, %v372_v13  ;;  %v377_v18 = vmul.f32 0.2, %v373_v14  ;;  %v378_v19 = vmul.f32 0.2, %v374_v15 }
 0x193   :  { %v379_v20 = vmul.f32 0.2, %v375_v16 }
 0x194   :  { %v380_v6 = vmax.f32 %v372_v13, %v376_v17  ;;  %v381_v21 = vmax.f32 %v373_v14, %v377_v18  ;;  %v382_v22 = vmax.f32 %v374_v15, %v378_v19 }
 0x195   :  { %v383_v23 = vmax.f32 %v375_v16, %v379_v20 }
 0x196   :  { %384 = vst [vmem:[#allocation2 + $0x1] sm:$0xff] %v380_v6  ;;  %517 = vmatmul.f32.vlgmr.msrb.gmra.mxu1 %v380_v6 }
 0x197   :  { %385 = vst [vmem:[#allocation2 + $0x9] sm:$0xff] %v381_v21 }
 0x198   :  { %386 = vst [vmem:[#allocation2 + $0x19] sm:$0xff] %v382_v22 }
 0x199   :  { %387 = vst [vmem:[#allocation2 + $0x21] sm:$0xff] %v383_v23 }
 0x19d   :  { %v388_v25 = vld [vmem:[#allocation2] sm:$0xff] }
 0x19e   :  { %488 = vmatmul.f32.vlgmr.msrb.gmra.mxu0 %v388_v25  ;;  %v404_v26 = vld [vmem:[#allocation2 + $0x2] sm:$0xff]  ;;  %520 = vmatmul.f32.gmra.mxu1 %v381_v21  ;;  %v405_v42 = vld [vmem:[#allocation2 + $0xa] sm:$0xff] }
 0x19f   :  { %546 = vmatmul.f32.vlgmr.msrb.gmra.mxu2 %v404_v26  ;;  %v389_v28 = vld [vmem:[#allocation2 + $0x8] sm:$0xff]  ;;  %v390_v24 = vld [vmem:[#allocation2 + $0x18] sm:$0xff] }
 0x1a0   :  { %v406_v30 = vld [vmem:[#allocation2 + $0x1a] sm:$0xff]  ;;  %v407_v33 = vld [vmem:[#allocation2 + $0x22] sm:$0xff] }
 0x1a1   :  { %v391_v31 = vld [vmem:[#allocation2 + $0x20] sm:$0xff] }
 0x1a6   :  { %491 = vmatmul.f32.gmra.mxu0 %v389_v28  ;;  %523 = vmatmul.f32.gmra.mxu1 %v382_v22 }
 0x1a7   :  { %549 = vmatmul.f32.gmra.mxu2 %v405_v42  ;;  %v623_v42 = vld [vmem:[%s983_s5] sm:$0x1]  ;;  %s838_s5 = smov [#allocation12]  }
 0x1ae   :  { %494 = vmatmul.f32.gmra.mxu0 %v390_v24  ;;  %526 = vmatmul.f32.gmra.mxu1 %v383_v23 }
 0x1af   :  { %552 = vmatmul.f32.gmra.mxu2 %v406_v30 }
 0x1b6   :  { %497 = vmatmul.f32.gmra.mxu0 %v391_v31  ;;  %v641_v31 = vld [vmem:[%s984_s6] sm:$0x1]  ;;  %s674_s6 = sshll.u32 %s838_s5, 4  ;;  %s675_s6 = int_to_ptr.vmem [resolvable:$true] %s674_s6 }
 0x1b7   :  { %555 = vmatmul.f32.gmra.mxu2 %v407_v33 }
 0x213   :  { %v518_v35 = vpop.f32.mrf.mxu1 }
 0x21b   :  { %v489_v36 = vpop.f32.mrf.mxu0  ;;  %v521_v39 = vpop.f32.mrf.mxu1 }
 0x21c   :  { %v519_v46 = vadd.f32 %v518_v35, %v489_v36 }
 0x222   :  { %v547_v37 = vpop.f32.mrf.mxu2 }
 0x223   :  { %v492_v38 = vpop.f32.mrf.mxu0  ;;  %v524_v43 = vpop.f32.mrf.mxu1  ;;  %v548_v49 = vadd.f32 %v547_v37, %v519_v46 }
 0x224   :  { %v522_v44 = vadd.f32 %v521_v39, %v492_v38 }
 0x225   :  { %v568_v54 = vmul.f32 %v548_v49, %v548_v49 }
 0x22a   :  { %v550_v40 = vpop.f32.mrf.mxu2 }
 0x22b   :  { %v495_v41 = vpop.f32.mrf.mxu0  ;;  %v551_v47 = vadd.f32 %v550_v40, %v522_v44  ;;  %v527_v53 = vpop.f32.mrf.mxu1 }
 0x22c   :  { %v525_v48 = vadd.f32 %v524_v43, %v495_v41 }
 0x22d   :  { %v569_v52 = vmul.f32 %v551_v47, %v551_v47  ;;  %v559_v55 = vadd.f32 %v551_v47, %v548_v49 }
 0x22f   :  { %v572_v59 = vadd.f32 %v569_v52, %v568_v54 }
 0x232   :  { %v553_v45 = vpop.f32.mrf.mxu2 }
 0x233   :  { %v554_v50 = vadd.f32 %v553_v45, %v525_v48  ;;  %v498_v51 = vpop.f32.mrf.mxu0 }
 0x234   :  { %v528_v57 = vadd.f32 %v527_v53, %v498_v51 }
 0x235   :  { %v570_v56 = vmul.f32 %v554_v50, %v554_v50  ;;  %v560_v60 = vadd.f32 %v559_v55, %v554_v50 }
 0x237   :  { %v573_v62 = vadd.f32 %v572_v59, %v570_v56 }
 0x23a   :  { %v556_v58 = vpop.f32.mrf.mxu2 }
 0x23b   :  { %v557_v61 = vadd.f32 %v556_v58, %v528_v57 }
 0x23d   :  { %v561_v63 = vadd.f32 %v560_v60, %v557_v61  ;;  %v571_v0 = vmul.f32 %v557_v61, %v557_v61 }
 0x23f   :  { %v562_v1 = vrot.slane %v561_v63, 4  ;;  %v574_v2 = vadd.f32 %v573_v62, %v571_v0 }
 0x241   :  { %v563_v3 = vadd.f32 %v562_v1, %v561_v63  ;;  %v575_v4 = vrot.slane %v574_v2, 4 }
 0x243   :  { %v564_v5 = vrot.slane %v563_v3, 2  ;;  %v576_v7 = vadd.f32 %v575_v4, %v574_v2 }
 0x245   :  { %v565_v8 = vadd.f32 %v564_v5, %v563_v3  ;;  %v577_v9 = vrot.slane %v576_v7, 2 }
 0x247   :  { %v566_v10 = vrot.slane %v565_v8, 1  ;;  %v578_v11 = vadd.f32 %v577_v9, %v576_v7 }
 0x249   :  { %v579_v12 = vrot.slane %v578_v11, 1  ;;  %v567_v13 = vadd.f32 %v566_v10, %v565_v8 }
 0x24b   :  { %v580_v14 = vadd.f32 %v579_v12, %v578_v11 }
 0x24d   :  { %v581_v15 = vsel %vm298_vm0, %v567_v13, %v580_v14 }
 0x24e   :  { %614 = vmatmul.f32.vlgmr.msrb.gmra.mxu3 %v581_v15 }
 0x2d1   :  { %v615_v16 = vpop.f32.mrf.mxu3 }
 0x2d2   :  { %v618_v17 = vmul.f32 %v615_v16, %v615_v16 }
 0x2d4   :  { %v620_v18 = vrot.slane %v618_v17, 7 }
 0x2d6   :  { %v622_v19 = vsub.f32 %v615_v16, %v620_v18 }
 0x2d8   :  { %v624_v20 = vadd.f32 1e-05, %v622_v19 }
 0x2da   :  { %701 = vrsqrt.f32 %v624_v20  ;;  %vm631_vm5 = vweird.f32 %v624_v20 }
 0x2e0   :  { %v702_v6 = vpop.eup %701 }
 0x2e1   :  { %v626_v21 = vmul.f32 %v702_v6, %v624_v20  ;;  %vm632_vm4 = vweird.f32 %v702_v6 }
 0x2e2   :  { %vm633_vm6 = vmor %vm631_vm5, %vm632_vm4 }
 0x2e3   :  { %v627_v22 = vmul.f32 %v702_v6, %v626_v21 }
 0x2e5   :  { %v628_v23 = vmul.f32 0.5, %v627_v22 }
 0x2e7   :  { %v629_v25 = vsub.f32 1.5, %v628_v23 }
 0x2e9   :  { %v630_v26 = vmul.f32 %v702_v6, %v629_v25 }
 0x2eb   :  { %v634_v28 = vsel %vm633_vm6, %v702_v6, %v630_v26 }
 0x2ec   :  { %636 = vst [vmem:[#allocation1] sm:$0xff] %v634_v28 }
 0x2f3   :  { %v638_v24 = vld [vmem:[#allocation1 + $0x1] ss:$9 sm:$0xff] }
 0x2f4   :  { %v640_v30 = vmul.f32 %v638_v24, %v623_v42 }
 0x2f6   :  { %v642_v33 = vmul.f32 %v640_v30, %v615_v16  ;;  %v645_v35 = vperm.slane %v640_v30, 0 }
 0x2f8   :  { %v643_v36 = vsub.f32 %v641_v31, %v642_v33  ;;  %v647_v37 = vmul.f32 %v645_v35, %v548_v49  ;;  %v648_v38 = vmul.f32 %v645_v35, %v551_v47  ;;  %v649_v39 = vmul.f32 %v645_v35, %v554_v50 }
 0x2f9   :  { %v650_v40 = vmul.f32 %v645_v35, %v557_v61 }
 0x2fa   :  { %v652_v41 = vperm.slane %v643_v36, 0 }
 0x2fc   :  { %v654_v43 = vadd.f32 %v652_v41, %v647_v37  ;;  %v655_v44 = vadd.f32 %v652_v41, %v648_v38  ;;  %v656_v45 = vadd.f32 %v652_v41, %v649_v39  ;;  %v657_v46 = vadd.f32 %v652_v41, %v650_v40 }
 0x2fe   :  { %v662_v48 = vadd.f32 %v654_v43, %v908_v27  ;;  %v663_v51 = vadd.f32 %v655_v44, %v910_v29  ;;  %v664_v52 = vadd.f32 %v656_v45, %v914_v32  ;;  %v665_v47 = vadd.f32 %v657_v46, %v916_v34 }
 0x300   :  { %666 = vst [vmem:[#allocation12] sm:$0xff] %v662_v48 }
 0x301   :  { %667 = vst [vmem:[#allocation12 + $0x8] sm:$0xff] %v663_v51 }
 0x302   :  { %668 = vst [vmem:[#allocation12 + $0x10] sm:$0xff] %v664_v52 }
 0x303   :  { %669 = vst [vmem:[#allocation12 + $0x18] sm:$0xff] %v665_v47 }
 0x304   :  { %682 = dma.vmem_to_hbm [thread:$0]  %s675_s6, 512, %s677_s9, [#allocation6], %s832_s13, %s832_s13, %s833_s14  }
 0x305   :  { %829 = dma.done.wait [#allocation6], 512  }
 0x306   :  { %830 = vsyncadd [#allocation6], 4294966784 }
 0x307   :  { %687 = vsyncpa [#allocation5], 1 }
 0x308   :  { %688 = vsyncpa [#allocation8], 1 }
 0x309   :  { %689 = vsyncpa [#allocation11], 1 }
 0x30a   :  { %690 = vsyncpa [#allocation6], 1 }

</bundles_post_ra>
